<compile_context>
chip_gen: v5e
topology: v5e:2x2
jax: 0.10.0
libtpu: 0.0.40
codegen_flags: <defaults>
</compile_context>

<pallas_src>
import functools

import jax
import jax.numpy as jnp
from jax import lax
from jax.experimental import pallas as pl
from jax.experimental.pallas import tpu as pltpu


# ----------------------------------------------------------------------------
# Fused 3x3 conv (+bias, ReLU) Pallas kernel, with an optional fused 1x1 "head"
# matmul epilogue (used for the RPN score/loc convs).
#
# Host side pre-gathers the 3 kw taps along channels, so the kernel input per
# image is a flat (Hp*Wp, 3*C) slab; the 3 kh taps become tile-aligned row
# slices (offset i*Wp, Wp a multiple of 16) feeding 3 MXU dots.
# ----------------------------------------------------------------------------
def _conv3x3_kernel(x_ref, w_ref, b_ref, *rest, Wp, n_out, fuse_head):
    if fuse_head:
        hw_ref, hb_ref, o_ref = rest
    else:
        (o_ref,) = rest

    # kh tap 0
    acc = jnp.dot(x_ref[0, pl.ds(0, n_out), :], w_ref[0],
                  preferred_element_type=jnp.float32)
    # kh taps 1, 2 (tile-aligned slices: i*Wp is a multiple of 16)
    for i in (1, 2):
        acc = acc + jnp.dot(x_ref[0, pl.ds(i * Wp, n_out), :], w_ref[i],
                            preferred_element_type=jnp.float32)

    acc = jnp.maximum(acc + b_ref[...], 0.0)               # + bias, ReLU

    if fuse_head:
        # fused 1x1 head convs: hidden activation never leaves VMEM
        out = jnp.dot(acc.astype(jnp.bfloat16), hw_ref[...],
                      preferred_element_type=jnp.float32) + hb_ref[...]
    else:
        out = acc
    o_ref[...] = out[None].astype(o_ref.dtype)


def conv3x3(x_nhwc, w_mat, b, head_w=None, head_b=None):
    """3x3 / pad=1 / stride=1 conv + ReLU; optional fused 1x1 head matmul.

    w_mat rows are ordered (kh, kw, c_in), cols are c_out (same as before).
    Returns (B, H, W, Cout) where Cout = head_w.shape[1] if a head is fused,
    else w_mat.shape[1].
    """
    B, H, W, C = x_nhwc.shape
    Cout = w_mat.shape[1]
    Wp = ((W + 15) // 16) * 16        # bf16-tile-aligned padded width
    Hp = H + 2
    n_out = H * Wp

    # spatial zero-pad (1 px), then gather the 3 kw taps into the channel dim
    xsp = jnp.pad(x_nhwc, ((0, 0), (1, 1), (1, 1), (0, 0)))
    xcat = jnp.concatenate([xsp[:, :, j:j + W, :] for j in range(3)], axis=-1)
    if Wp > W:
        xcat = jnp.pad(xcat, ((0, 0), (0, 0), (0, Wp - W), (0, 0)))
    xcat = xcat.reshape(B, Hp * Wp, 3 * C).astype(jnp.bfloat16)

    w3 = w_mat.reshape(3, 3 * C, Cout).astype(jnp.bfloat16)     # (kh, kw*cin, cout)
    b2 = b.reshape(1, Cout).astype(jnp.float32)

    fuse_head = head_w is not None
    if fuse_head:
        Nout = head_w.shape[1]
        hw = head_w.astype(jnp.bfloat16)
        hb = head_b.reshape(1, Nout).astype(jnp.float32)
        inputs = (xcat, w3, b2, hw, hb)
        in_specs = [
            pl.BlockSpec((1, Hp * Wp, 3 * C), lambda bi: (bi, 0, 0)),
            pl.BlockSpec((3, 3 * C, Cout), lambda bi: (0, 0, 0)),
            pl.BlockSpec((1, Cout), lambda bi: (0, 0)),
            pl.BlockSpec((Cout, Nout), lambda bi: (0, 0)),
            pl.BlockSpec((1, Nout), lambda bi: (0, 0)),
        ]
    else:
        Nout = Cout
        inputs = (xcat, w3, b2)
        in_specs = [
            pl.BlockSpec((1, Hp * Wp, 3 * C), lambda bi: (bi, 0, 0)),
            pl.BlockSpec((3, 3 * C, Cout), lambda bi: (0, 0, 0)),
            pl.BlockSpec((1, Cout), lambda bi: (0, 0)),
        ]

    kernel = functools.partial(_conv3x3_kernel, Wp=Wp, n_out=n_out,
                               fuse_head=fuse_head)
    out = pl.pallas_call(
        kernel,
        out_shape=jax.ShapeDtypeStruct((B, n_out, Nout), jnp.float32),
        grid=(B,),
        in_specs=in_specs,
        out_specs=pl.BlockSpec((1, n_out, Nout), lambda bi: (bi, 0, 0)),
        compiler_params=pltpu.CompilerParams(dimension_semantics=("parallel",)),
    )(*inputs)

    return out.reshape(B, H, Wp, Nout)[:, :, :W, :]


# ----------------------------------------------------------------------------
# Pallas RoIPool kernel (torchvision RoIPool semantics, max pooling per bin).
# Boxes are a flat 1-D SMEM array (R*5,) = R x [batch_idx, x1, y1, x2, y2].
# Output is lane-dense flattened: (R, ph*pw*C) with (ph, pw, C)-major order.
# Factored reduction: per row-bin masked max over h first, then per column bin.
# ----------------------------------------------------------------------------
def _roi_pool_kernel(boxes_ref, fm_ref, o_ref, *, ph, pw, spatial_scale, fh, fw, C):
    r = pl.program_id(0)
    base = r * 5
    b = boxes_ref[base + 0].astype(jnp.int32)
    x1 = jnp.round(boxes_ref[base + 1] * spatial_scale).astype(jnp.int32)
    y1 = jnp.round(boxes_ref[base + 2] * spatial_scale).astype(jnp.int32)
    x2 = jnp.round(boxes_ref[base + 3] * spatial_scale).astype(jnp.int32)
    y2 = jnp.round(boxes_ref[base + 4] * spatial_scale).astype(jnp.int32)
    roi_w = jnp.maximum(x2 - x1 + 1, 1).astype(jnp.float32)
    roi_h = jnp.maximum(y2 - y1 + 1, 1).astype(jnp.float32)
    bin_h = roi_h / ph
    bin_w = roi_w / pw

    fm = fm_ref[b]                                        # (fh, fw, C)
    h_iota = lax.broadcasted_iota(jnp.int32, (fh, fw), 0)
    w_iota = lax.broadcasted_iota(jnp.int32, (fw, C), 0)

    bins = []
    for i in range(ph):
        hstart = jnp.clip(jnp.floor(i * bin_h).astype(jnp.int32) + y1, 0, fh)
        hend = jnp.clip(jnp.ceil((i + 1) * bin_h).astype(jnp.int32) + y1, 0, fh)
        hmask = (h_iota >= hstart) & (h_iota < hend)      # (fh, fw)
        rowmax = jnp.max(jnp.where(hmask[:, :, None], fm, -jnp.inf), axis=0)  # (fw, C)
        for j in range(pw):
            wstart = jnp.clip(jnp.floor(j * bin_w).astype(jnp.int32) + x1, 0, fw)
            wend = jnp.clip(jnp.ceil((j + 1) * bin_w).astype(jnp.int32) + x1, 0, fw)
            wmask = (w_iota >= wstart) & (w_iota < wend)  # (fw, C)
            mx = jnp.max(jnp.where(wmask, rowmax, -jnp.inf),
                         axis=0, keepdims=True)           # (1, C)
            is_empty = (hend <= hstart) | (wend <= wstart)
            bins.append(jnp.where(is_empty, jnp.zeros_like(mx), mx))
    row = jnp.concatenate(bins, axis=1)                   # (1, ph*pw*C)
    o_ref[...] = row.astype(o_ref.dtype)


def pallas_roi_pool(feature_map_nhwc, boxes, output_size, spatial_scale):
    B, H, W, C = feature_map_nhwc.shape
    R = boxes.shape[0]
    ph, pw = output_size
    kernel = functools.partial(
        _roi_pool_kernel, ph=ph, pw=pw,
        spatial_scale=float(spatial_scale), fh=H, fw=W, C=C)
    return pl.pallas_call(
        kernel,
        out_shape=jax.ShapeDtypeStruct((R, ph * pw * C), jnp.float32),
        grid=(R,),
        in_specs=[
            pl.BlockSpec(memory_space=pltpu.MemorySpace.SMEM),        # boxes (R*5,)
            pl.BlockSpec((B, H, W, C), lambda r: (0, 0, 0, 0)),       # full feature map
        ],
        out_specs=pl.BlockSpec((1, ph * pw * C), lambda r: (r, 0)),
        compiler_params=pltpu.CompilerParams(dimension_semantics=("parallel",)),
    )(boxes.reshape(-1), feature_map_nhwc)


# ----------------------------------------------------------------------------
# Fused classifier kernel: fc1 + ReLU + concatenated (loc | score) heads.
# The hidden activation never leaves VMEM; bf16 MXU inputs, f32 accumulation.
# ----------------------------------------------------------------------------
def _classifier_kernel(x_ref, w1_ref, b1_ref, w2_ref, b2_ref, o_ref):
    h = jnp.dot(x_ref[...].astype(jnp.bfloat16), w1_ref[...],
                preferred_element_type=jnp.float32)
    h = jnp.maximum(h + b1_ref[...], 0.0)
    out = jnp.dot(h.astype(jnp.bfloat16), w2_ref[...],
                  preferred_element_type=jnp.float32) + b2_ref[...]
    o_ref[...] = out.astype(o_ref.dtype)


def pallas_classifier(pooled, w1, b1, w2, b2):
    R, D = pooled.shape
    Hd = w1.shape[1]
    N2 = w2.shape[1]
    return pl.pallas_call(
        _classifier_kernel,
        out_shape=jax.ShapeDtypeStruct((R, N2), jnp.float32),
        grid=(1,),
        in_specs=[
            pl.BlockSpec((R, D), lambda i: (0, 0)),
            pl.BlockSpec((D, Hd), lambda i: (0, 0)),
            pl.BlockSpec((1, Hd), lambda i: (0, 0)),
            pl.BlockSpec((Hd, N2), lambda i: (0, 0)),
            pl.BlockSpec((1, N2), lambda i: (0, 0)),
        ],
        out_specs=pl.BlockSpec((R, N2), lambda i: (0, 0)),
    )(pooled,
      w1.astype(jnp.bfloat16), b1.reshape(1, Hd).astype(jnp.float32),
      w2.astype(jnp.bfloat16), b2.reshape(1, N2).astype(jnp.float32))


# ----------------------------------------------------------------------------
# Synthetic config + deterministic parameter initialization.
# ----------------------------------------------------------------------------
class Config:
    training = False
    feat_stride = 1
    num_classes = 5
    H_roi_pool = 2
    W_roi_pool = 2


C_IN = 3        # image channels
C_FEAT = 8      # extractor output channels
C_MID = 8       # RPN mid channels
N_ANCHOR = 3
HIDDEN = 32


def init_params(key):
    ks = jax.random.split(key, 8)
    p = {}
    p["ext_w"] = 0.1 * jax.random.normal(ks[0], (9 * C_IN, C_FEAT), jnp.float32)
    p["ext_b"] = jnp.zeros((C_FEAT,), jnp.float32)
    p["rpn_conv_w"] = 0.1 * jax.random.normal(ks[1], (9 * C_FEAT, C_MID), jnp.float32)
    p["rpn_conv_b"] = jnp.zeros((C_MID,), jnp.float32)
    p["rpn_score_w"] = 0.1 * jax.random.normal(ks[2], (C_MID, 2 * N_ANCHOR), jnp.float32)
    p["rpn_score_b"] = jnp.zeros((2 * N_ANCHOR,), jnp.float32)
    p["rpn_loc_w"] = 0.1 * jax.random.normal(ks[3], (C_MID, 4 * N_ANCHOR), jnp.float32)
    p["rpn_loc_b"] = jnp.zeros((4 * N_ANCHOR,), jnp.float32)
    pooled_dim = C_FEAT * Config.H_roi_pool * Config.W_roi_pool
    p["fc1_w"] = 0.1 * jax.random.normal(ks[4], (pooled_dim, HIDDEN), jnp.float32)
    p["fc1_b"] = jnp.zeros((HIDDEN,), jnp.float32)
    p["loc_w"] = 0.1 * jax.random.normal(ks[5], (HIDDEN, Config.num_classes * 4), jnp.float32)
    p["loc_b"] = jnp.zeros((Config.num_classes * 4,), jnp.float32)
    p["score_w"] = 0.1 * jax.random.normal(ks[6], (HIDDEN, Config.num_classes), jnp.float32)
    p["score_b"] = jnp.zeros((Config.num_classes,), jnp.float32)
    return p


# ----------------------------------------------------------------------------
# Forward pass (mirrors FasterRCNN.forward).
# ----------------------------------------------------------------------------
def faster_rcnn_forward(params, im_nchw, config):
    # PyTorch NCHW -> NHWC
    x = jnp.transpose(im_nchw, (0, 2, 3, 1)).astype(jnp.float32)
    B, Himg, Wimg, _ = x.shape

    # extractor: 3x3 conv + ReLU (one fused Pallas kernel, one image per step)
    feature_map = conv3x3(x, params["ext_w"], params["ext_b"])
    _, H, W, C = feature_map.shape

    # RPN head: 3x3 conv + ReLU with both 1x1 score/loc convs fused into the
    # same kernel's epilogue (rpn_mid never round-trips through HBM).
    head_w = jnp.concatenate([params["rpn_score_w"], params["rpn_loc_w"]], axis=1)
    head_b = jnp.concatenate([params["rpn_score_b"], params["rpn_loc_b"]], axis=0)
    rpn_head = conv3x3(feature_map, params["rpn_conv_w"], params["rpn_conv_b"],
                       head_w=head_w, head_b=head_b)          # (B, H, W, 6*A)
    rpn_score = rpn_head[..., :2 * N_ANCHOR]
    rpn_loc = rpn_head[..., 2 * N_ANCHOR:]

    # Deterministic proposal boxes (one quadrant-grid per image), (R, 5):
    # [batch_idx, x1, y1, x2, y2].
    # TODO(synk): anchor decoding + NMS proposal selection has no clean Pallas
    #             equivalent; replaced by deterministic grid proposals.
    hh, hw = Himg // 2, Wimg // 2
    boxes = []
    for b in range(B):
        boxes += [
            [b, 0, 0, hw - 1, hh - 1],
            [b, hw, 0, Wimg - 1, hh - 1],
            [b, 0, hh, hw - 1, Himg - 1],
            [b, hw, hh, Wimg - 1, Himg - 1],
        ]
    boxes = jnp.array(boxes, dtype=jnp.float32)

    rpn_proposals = {"boxes": boxes, "locs": rpn_loc, "scores": rpn_score}
    rpn_targets = None
    rpn_loss = {"reg_loss": 0, "cls_loss": 0}

    # pool_input[:, 1:] *= 1 / feat_stride   (as in the PyTorch module, which
    # scales here AND passes spatial_scale=1/feat_stride to RoIPool).
    pool_input = boxes.at[:, 1:].multiply(1.0 / config.feat_stride)

    # RoIPool -> lane-dense (R, ph*pw*C) with (ph, pw, C)-major flatten order.
    pooled = pallas_roi_pool(
        feature_map, pool_input,
        (config.H_roi_pool, config.W_roi_pool),
        1.0 / config.feat_stride)

    # classifier: fc1 + ReLU + both heads in a single fused kernel.
    # fc1 rows are permuted so the kernel's (ph, pw, C)-major pooled layout
    # matches PyTorch's (R, C, ph, pw).view(R, -1) flatten convention.
    phpw = config.H_roi_pool * config.W_roi_pool
    perm = jnp.arange(C * phpw).reshape(C, phpw).T.reshape(-1)
    cls_head_w = jnp.concatenate([params["loc_w"], params["score_w"]], axis=1)
    cls_head_b = jnp.concatenate([params["loc_b"], params["score_b"]], axis=0)
    cls_out = pallas_classifier(pooled, params["fc1_w"][perm], params["fc1_b"],
                                cls_head_w, cls_head_b)
    loc = cls_out[:, :config.num_classes * 4].reshape(-1, config.num_classes, 4)
    score = cls_out[:, config.num_classes * 4:]

    rcnn_proposals = {"locs": loc, "scores": score}
    rcnn_loss = {"reg_loss": 0, "cls_loss": 0}
    # config.training is False -> no fastrcnn_loss_fn call.

    return [rpn_proposals, rcnn_proposals, rpn_loss, rcnn_loss, rpn_targets]


if __name__ == "__main__":
    key = jax.random.PRNGKey(0)
    pkey, ikey = jax.random.split(key)
    params = init_params(pkey)
    im = jax.random.normal(ikey, (2, C_IN, 16, 16), dtype=jnp.float32)  # NCHW like PyTorch

    out = faster_rcnn_forward(params, im, Config)
    rpn_proposals, rcnn_proposals, rpn_loss, rcnn_loss, rpn_targets = out

    jax.block_until_ready(rcnn_proposals["locs"])
    jax.block_until_ready(rcnn_proposals["scores"])
    jax.block_until_ready(rpn_proposals["scores"])

    assert rcnn_proposals["locs"].shape == (8, Config.num_classes, 4)
    assert rcnn_proposals["scores"].shape == (8, Config.num_classes)
    assert rpn_proposals["scores"].shape == (2, 16, 16, 2 * N_ANCHOR)
    assert rpn_proposals["locs"].shape == (2, 16, 16, 4 * N_ANCHOR)
    print("KERNEL_OK")
</pallas_src>

<mosaic_0001>
module attributes {stable_mosaic.version = 11 : i64} {
  func.func @_conv3x3_kernel(%arg0: i32, %arg1: memref<1x288x9xbf16, #tpu.memory_space<vmem>>, %arg2: memref<3x9x8xbf16, #tpu.memory_space<vmem>>, %arg3: memref<1x8xf32, #tpu.memory_space<vmem>>, %arg4: memref<1x256x8xf32, #tpu.memory_space<vmem>>) attributes {dimension_semantics = [#tpu.dimension_semantics<parallel>], iteration_bounds = array<i64: 2>, scalar_prefetch = 0 : i64, scratch_operands = 0 : i64, tpu.core_type = #tpu.core_type<tc>, window_params = [{transform_indices = @transform_0, window_bounds = array<i64: 1, 288, 9>}, {pipeline_mode = #tpu.pipeline_mode<synchronous>, transform_indices = @transform_1, window_bounds = array<i64: 3, 9, 8>}, {pipeline_mode = #tpu.pipeline_mode<synchronous>, transform_indices = @transform_2, window_bounds = array<i64: 1, 8>}, {transform_indices = @transform_3, window_bounds = array<i64: 1, 256, 8>}]} {
    %c0 = arith.constant 0 : index
    %c0_0 = arith.constant 0 : index
    %c0_1 = arith.constant 0 : index
    %0 = vector.load %arg1[%c0, %c0_0, %c0_1] : memref<1x288x9xbf16, #tpu.memory_space<vmem>>, vector<1x256x9xbf16>
    %1 = vector.shape_cast %0 : vector<1x256x9xbf16> to vector<256x9xbf16>
    %c0_2 = arith.constant 0 : index
    %c0_3 = arith.constant 0 : index
    %c0_4 = arith.constant 0 : index
    %2 = vector.load %arg2[%c0_2, %c0_3, %c0_4] : memref<3x9x8xbf16, #tpu.memory_space<vmem>>, vector<1x9x8xbf16>
    %3 = vector.shape_cast %2 : vector<1x9x8xbf16> to vector<9x8xbf16>
    %cst = arith.constant dense<0.000000e+00> : vector<256x8xf32>
    %4 = tpu.matmul %1, %3, %cst {dimension_numbers = #tpu.dot_dimension_numbers<[1], [0], [0], [1], [0, 0, 1, 1], [], []>} : vector<256x9xbf16>, vector<9x8xbf16>, vector<256x8xf32> -> vector<256x8xf32>
    %c0_5 = arith.constant 0 : index
    %c16 = arith.constant 16 : index
    %c0_6 = arith.constant 0 : index
    %5 = vector.load %arg1[%c0_5, %c16, %c0_6] : memref<1x288x9xbf16, #tpu.memory_space<vmem>>, vector<1x256x9xbf16>
    %6 = vector.shape_cast %5 : vector<1x256x9xbf16> to vector<256x9xbf16>
    %c1 = arith.constant 1 : index
    %c0_7 = arith.constant 0 : index
    %c0_8 = arith.constant 0 : index
    %7 = vector.load %arg2[%c1, %c0_7, %c0_8] : memref<3x9x8xbf16, #tpu.memory_space<vmem>>, vector<1x9x8xbf16>
    %8 = vector.shape_cast %7 : vector<1x9x8xbf16> to vector<9x8xbf16>
    %cst_9 = arith.constant dense<0.000000e+00> : vector<256x8xf32>
    %9 = tpu.matmul %6, %8, %cst_9 {dimension_numbers = #tpu.dot_dimension_numbers<[1], [0], [0], [1], [0, 0, 1, 1], [], []>} : vector<256x9xbf16>, vector<9x8xbf16>, vector<256x8xf32> -> vector<256x8xf32>
    %10 = arith.addf %4, %9 : vector<256x8xf32>
    %c0_10 = arith.constant 0 : index
    %c32 = arith.constant 32 : index
    %c0_11 = arith.constant 0 : index
    %11 = vector.load %arg1[%c0_10, %c32, %c0_11] : memref<1x288x9xbf16, #tpu.memory_space<vmem>>, vector<1x256x9xbf16>
    %12 = vector.shape_cast %11 : vector<1x256x9xbf16> to vector<256x9xbf16>
    %c2 = arith.constant 2 : index
    %c0_12 = arith.constant 0 : index
    %c0_13 = arith.constant 0 : index
    %13 = vector.load %arg2[%c2, %c0_12, %c0_13] : memref<3x9x8xbf16, #tpu.memory_space<vmem>>, vector<1x9x8xbf16>
    %14 = vector.shape_cast %13 : vector<1x9x8xbf16> to vector<9x8xbf16>
    %cst_14 = arith.constant dense<0.000000e+00> : vector<256x8xf32>
    %15 = tpu.matmul %12, %14, %cst_14 {dimension_numbers = #tpu.dot_dimension_numbers<[1], [0], [0], [1], [0, 0, 1, 1], [], []>} : vector<256x9xbf16>, vector<9x8xbf16>, vector<256x8xf32> -> vector<256x8xf32>
    %16 = arith.addf %10, %15 : vector<256x8xf32>
    %c0_15 = arith.constant 0 : index
    %c0_16 = arith.constant 0 : index
    %17 = vector.load %arg3[%c0_15, %c0_16] : memref<1x8xf32, #tpu.memory_space<vmem>>, vector<1x8xf32>
    %18 = vector.broadcast %17 : vector<1x8xf32> to vector<256x8xf32>
    %19 = arith.addf %16, %18 : vector<256x8xf32>
    %cst_17 = arith.constant 0.000000e+00 : f32
    %20 = vector.broadcast %cst_17 : f32 to vector<256x8xf32>
    %21 = arith.maximumf %19, %20 : vector<256x8xf32>
    %22 = vector.shape_cast %21 : vector<256x8xf32> to vector<1x256x8xf32>
    %c0_18 = arith.constant 0 : index
    %c0_19 = arith.constant 0 : index
    %c0_20 = arith.constant 0 : index
    %23 = vector.load %arg4[%c0_18, %c0_19, %c0_20] : memref<1x256x8xf32, #tpu.memory_space<vmem>>, vector<1x256x8xf32>
    tpu.vector_store %arg4[%c0_18, %c0_19, %c0_20], %22 {strides = array<i32>} : memref<1x256x8xf32, #tpu.memory_space<vmem>>, vector<1x256x8xf32>,
    return
  }
  func.func @transform_0(%arg0: i32) -> (i32, i32, i32) {
    %c0_i32 = arith.constant 0 : i32
    %c0_i32_0 = arith.constant 0 : i32
    %c0_i32_1 = arith.constant 0 : i32
    return %arg0, %c0_i32, %c0_i32_0 : i32, i32, i32
  }
  func.func @transform_1(%arg0: i32) -> (i32, i32, i32) {
    %c0_i32 = arith.constant 0 : i32
    %c0_i32_0 = arith.constant 0 : i32
    %c0_i32_1 = arith.constant 0 : i32
    %c0_i32_2 = arith.constant 0 : i32
    return %c0_i32, %c0_i32_0, %c0_i32_1 : i32, i32, i32
  }
  func.func @transform_2(%arg0: i32) -> (i32, i32) {
    %c0_i32 = arith.constant 0 : i32
    %c0_i32_0 = arith.constant 0 : i32
    %c0_i32_1 = arith.constant 0 : i32
    return %c0_i32, %c0_i32_0 : i32, i32
  }
  func.func @transform_3(%arg0: i32) -> (i32, i32, i32) {
    %c0_i32 = arith.constant 0 : i32
    %c0_i32_0 = arith.constant 0 : i32
    %c0_i32_1 = arith.constant 0 : i32
    return %arg0, %c0_i32, %c0_i32_0 : i32, i32, i32
  }
}

</mosaic_0001>

<bundles_post_ra>
// kernel: tpu_custom_call.1
= control target key start
LH: loop header
LB: loop body
LE: loop exit
PB: predicated region body
PF: predicated region fallthrough
CT: control target
= control target key end

     0   :  { %s1280_s12 = smov 0   ;;  %s1557_s0 = inlined_call_operand.vmem [shape: bf16[2,288,9], index: 0, kind: input, shape index: {}]   ;;  %s1558_s1 = inlined_call_operand.vmem [shape: bf16[3,9,8], index: 1, kind: input, shape index: {}]   ;;  %s1559_s2 = inlined_call_operand.vmem [shape: f32[1,8], index: 2, kind: input, shape index: {}]   ;;  %s1560_s3 = inlined_call_operand.vmem [shape: f32[2,256,8], index: 3, kind: output, shape index: {}]  }
   0x1 LB: > { %s994_s13 = sadd.s32 4294967295, %s1257_s12   ;;  %p998_p0 = scmp.ge.s32.totalorder %s1257_s12, 1  ;;  %s1257_s12 = sphi %s1280_s12, %s13_s12  }
   0x2   : > { %p137_p1 = scmp.lt.s32.totalorder %s1257_s12, 3 }
   0x4   : > { %p138_p2 = pnand %p998_p0, %p137_p1 }
   0x5   : > { %p161_p3 = scmp.lt.s32.totalorder (!%p138_p2), %s994_s13, 1 }
   0x6   : > { %141 = sbr.rel (%p138_p2) target bundleno = 345 (0x159), region = 32 }
   0xb   : > { %v1070_v0 = vld [vmem:[%s1558_s1 + $0x8] sm:$0xf]  ;;  %v1219_v1 = vld [vmem:[%s1558_s1 + $0x8] sm:$0x10]  ;;  %vm345_vm0 = vcmask 1043456   ;;  %vm346_vm1 = vcmask 1044480  }
   0xc   : > { %v1071_v2 = vor.u32 %v1219_v1, %v1070_v0  ;;  %v1094_v3 = vld [vmem:[%s1558_s1] sm:$0xf]  ;;  %v1217_v4 = vld [vmem:[%s1558_s1] sm:$0x10]  ;;  %v1259_v5 = vmov 65535   ;;  %s1562_s13 = smov (!%p161_p3, %s994_s13), 1 }
   0xd   : > { %v347_v6 = vsel %vm345_vm0, 4294967295, %v1259_v5  ;;  %v1095_v7 = vor.u32 %v1217_v4, %v1094_v3  ;;  %v1180_v8 = vld [vmem:[%s1558_s1 + $0x10] sm:$0xf]  ;;  %v1236_v9 = vld [vmem:[%s1558_s1 + $0x10] sm:$0x10]  ;;  %s1240_s26 = smul.u32 144, %s1562_s13 }
   0xe   : > { %v348_v10 = vsel %vm346_vm1, %v347_v6, 0  ;;  %v1181_v11 = vor.u32 %v1236_v9, %v1180_v8  ;;  %vm296_vm2 = vcmask 72704   ;;  %v1383_v44 = vld [vmem:[%s1559_s2] ss:$0 sm:$0xff]  ;;  %s1200_s5 = sshll.u32 %s1562_s13, 8  ;;  %vm906_vm3 = vcmask 64512  }
   0xf   : > { %v350_v12 = vand.u32 %v1071_v2, %v348_v10  ;;  %v455_v13 = vand.u32 %v1095_v7, %v348_v10  ;;  %s1312_s29 = scalar_lea.vmem %s1557_s0, %s1240_s26  ;;  %s1390_s8 = scalar_lea.vmem %s1560_s3, %s1200_s5 }
  0x10   : > { %v715_v14 = vand.u32 %v1181_v11, %v348_v10  ;;  %v1202_v15 = vld [vmem:[%s1312_s29 + $0x8] sm:$0xff]  ;;  %v1201_v17 = vld [vmem:[%s1312_s29] sm:$0xff]  ;;  %v1220_v18 = vld [vmem:[%s1312_s29 + $0x10] sm:$0xff] }
  0x11   : > { %359 = vmatpush.bf16.msra.mxu0 %v350_v12  ;;  %1237 = vmatpush.bf16.msra.mxu3 %v350_v12  ;;  %v1214_v16 = vld [vmem:[%s1312_s29 + $0x68] sm:$0xff]  ;;  %v1203_v19 = vld [vmem:[%s1312_s29 + $0x10] sm:$0xff]  ;;  %v1221_v21 = vld [vmem:[%s1312_s29 + $0x18] sm:$0xff] }
  0x12   : > { %464 = vmatpush.bf16.msra.mxu1 %v455_v13  ;;  %724 = vmatpush.bf16.msra.mxu2 %v715_v14  ;;  %v1215_v20 = vld [vmem:[%s1312_s29 + $0x70] sm:$0xff]  ;;  %v1204_v22 = vld [vmem:[%s1312_s29 + $0x18] sm:$0xff]  ;;  %v1222_v24 = vld [vmem:[%s1312_s29 + $0x20] sm:$0xff] }
  0x13   : > { %v1216_v23 = vld [vmem:[%s1312_s29 + $0x78] sm:$0xff]  ;;  %v1205_v25 = vld [vmem:[%s1312_s29 + $0x20] sm:$0xff]  ;;  %v1223_v27 = vld [vmem:[%s1312_s29 + $0x28] sm:$0xff] }
  0x14   : > { %1072 = vmatmul.msk.bf16.vlgmr.msra.gmra.mxu0 %vm296_vm2, %v1202_v15  ;;  %1084 = vmatmul.msk.bf16.vlgmr.msra.gmra.mxu3 %vm296_vm2, %v1214_v16  ;;  %v1218_v26 = vld [vmem:[%s1312_s29 + $0x80] sm:$0xff]  ;;  %v1206_v28 = vld [vmem:[%s1312_s29 + $0x28] sm:$0xff]  ;;  %v1224_v30 = vld [vmem:[%s1312_s29 + $0x30] sm:$0xff] }
  0x15   : > { %1238 = vmatpush.bf16.msrb.mxu3 %v455_v13  ;;  %1096 = vmatmul.msk.bf16.vlgmr.msra.gmra.mxu1 %vm296_vm2, %v1201_v17  ;;  %v1345_v29 = vld [vmem:[%s1312_s29 + $0x60] sm:$0xff]  ;;  %v1207_v31 = vld [vmem:[%s1312_s29 + $0x30] sm:$0xff]  ;;  %v1225_v32 = vld [vmem:[%s1312_s29 + $0x38] sm:$0xff] }
  0x16   : > { %1182 = vmatmul.msk.bf16.vlgmr.msra.gmra.mxu2 %vm296_vm2, %v1220_v18  ;;  %v1208_v33 = vld [vmem:[%s1312_s29 + $0x38] sm:$0xff]  ;;  %v1226_v34 = vld [vmem:[%s1312_s29 + $0x40] sm:$0xff]  ;;  %v1227_v36 = vld [vmem:[%s1312_s29 + $0x48] sm:$0xff] }
  0x17   : > { %v1209_v35 = vld [vmem:[%s1312_s29 + $0x40] sm:$0xff]  ;;  %v1210_v37 = vld [vmem:[%s1312_s29 + $0x48] sm:$0xff]  ;;  %v1232_v38 = vld [vmem:[%s1312_s29 + $0x70] sm:$0xff] }
  0x18   : > { %v1228_v40 = vld [vmem:[%s1312_s29 + $0x50] sm:$0xff]  ;;  %v1233_v55 = vld [vmem:[%s1312_s29 + $0x78] sm:$0xff]  ;;  %v1234_v10 = vld [vmem:[%s1312_s29 + $0x80] sm:$0xff] }
  0x19   : > { %1239 = vmatpush.bf16.msra.mxu3 %v715_v14  ;;  %v1211_v54 = vld [vmem:[%s1312_s29 + $0x50] sm:$0xff]  ;;  %v1229_v58 = vld [vmem:[%s1312_s29 + $0x58] sm:$0xff]  ;;  %v1230_v13 = vld [vmem:[%s1312_s29 + $0x60] sm:$0xff] }
  0x1a   : > { %v1212_v9 = vld [vmem:[%s1312_s29 + $0x58] sm:$0xff] }
  0x24   : > { %1073 = vmatmul.msk.bf16.gmra.mxu0 %vm296_vm2, %v1203_v19  ;;  %1085 = vmatmul.msk.bf16.gmra.mxu3 %vm296_vm2, %v1215_v20 }
  0x25   : > { %1097 = vmatmul.msk.bf16.gmra.mxu1 %vm296_vm2, %v1202_v15 }
  0x26   : > { %1183 = vmatmul.msk.bf16.gmra.mxu2 %vm296_vm2, %v1221_v21 }
  0x34   : > { %1074 = vmatmul.msk.bf16.gmra.mxu0 %vm296_vm2, %v1204_v22  ;;  %1086 = vmatmul.msk.bf16.gmra.mxu3 %vm296_vm2, %v1216_v23 }
  0x35   : > { %1098 = vmatmul.msk.bf16.gmra.mxu1 %vm296_vm2, %v1203_v19 }
  0x36   : > { %1184 = vmatmul.msk.bf16.gmra.mxu2 %vm296_vm2, %v1222_v24 }
  0x44   : > { %1075 = vmatmul.msk.bf16.gmra.mxu0 %vm296_vm2, %v1205_v25  ;;  %1087 = vmatmul.msk.bf16.gmra.mxu3 %vm296_vm2, %v1218_v26 }
  0x45   : > { %1099 = vmatmul.msk.bf16.gmra.mxu1 %vm296_vm2, %v1204_v22 }
  0x46   : > { %1185 = vmatmul.msk.bf16.gmra.mxu2 %vm296_vm2, %v1223_v27 }
  0x54   : > { %1076 = vmatmul.msk.bf16.gmra.mxu0 %vm296_vm2, %v1206_v28  ;;  %1108 = vmatmul.msk.bf16.vlgmr.msrb.gmra.mxu3 %vm296_vm2, %v1345_v29 }
  0x55   : > { %1100 = vmatmul.msk.bf16.gmra.mxu1 %vm296_vm2, %v1205_v25 }
  0x56   : > { %1186 = vmatmul.msk.bf16.gmra.mxu2 %vm296_vm2, %v1224_v30 }
  0x64   : > { %1077 = vmatmul.msk.bf16.gmra.mxu0 %vm296_vm2, %v1207_v31  ;;  %1109 = vmatmul.msk.bf16.gmra.mxu3 %vm296_vm2, %v1214_v16 }
  0x65   : > { %1101 = vmatmul.msk.bf16.gmra.mxu1 %vm296_vm2, %v1206_v28  ;;  %v1235_v28 = vld [vmem:[%s1312_s29 + $0x88] sm:$0xff] }
  0x66   : > { %1187 = vmatmul.msk.bf16.gmra.mxu2 %vm296_vm2, %v1225_v32  ;;  %v1231_v32 = vld [vmem:[%s1312_s29 + $0x68] sm:$0xff] }
  0x74   : > { %1078 = vmatmul.msk.bf16.gmra.mxu0 %vm296_vm2, %v1208_v33  ;;  %1110 = vmatmul.msk.bf16.gmra.mxu3 %vm296_vm2, %v1215_v20 }
  0x75   : > { %1102 = vmatmul.msk.bf16.gmra.mxu1 %vm296_vm2, %v1207_v31 }
  0x76   : > { %1188 = vmatmul.msk.bf16.gmra.mxu2 %vm296_vm2, %v1226_v34 }
  0x84   : > { %1079 = vmatmul.msk.bf16.gmra.mxu0 %vm296_vm2, %v1209_v35  ;;  %1111 = vmatmul.msk.bf16.gmra.mxu3 %vm296_vm2, %v1216_v23 }
  0x85   : > { %1103 = vmatmul.msk.bf16.gmra.mxu1 %vm296_vm2, %v1208_v33 }
  0x86   : > { %1189 = vmatmul.msk.bf16.gmra.mxu2 %vm296_vm2, %v1227_v36 }
  0x91   : > { %v361_v39 = vpop.f32.mrf.mxu0 }
  0x92   : > { %v466_v41 = vpop.f32.mrf.mxu1 }
  0x93   : > { %v467_v42 = vadd.f32 %v466_v41, %v361_v39 }
  0x94   : > { %1080 = vmatmul.msk.bf16.gmra.mxu0 %vm296_vm2, %v1210_v37  ;;  %1194 = vmatmul.msk.bf16.vlgmr.msra.gmra.mxu3 %vm296_vm2, %v1232_v38 }
  0x95   : > { %1104 = vmatmul.msk.bf16.gmra.mxu1 %vm296_vm2, %v1209_v35 }
  0x96   : > { %1190 = vmatmul.msk.bf16.gmra.mxu2 %vm296_vm2, %v1228_v40 }
  0x97   : > { %v1378_v43 = vpop.f32.mrf.mxu3 }
  0x99   : > { %v726_v45 = vpop.f32.mrf.mxu2  ;;  %v363_v47 = vpop.f32.mrf.mxu0 }
  0x9a   : > { %v806_v46 = vadd.f32 %v726_v45, %v467_v42  ;;  %v468_v48 = vpop.f32.mrf.mxu1 }
  0x9b   : > { %v469_v51 = vadd.f32 %v468_v48, %v363_v47 }
  0x9c   : > { %v842_v49 = vadd.f32 %v1383_v44, %v806_v46 }
  0x9e   : > { %v874_v50 = vmax.f32 %v842_v49, 0.0 }
  0x9f   : > { %v1394_v52 = vpop.f32.mrf.mxu3 }
  0xa0   : > { %907 = vst.msk [vmem:[%s1390_s8] sm:$0xff] %vm906_vm3, %v874_v50 }
  0xa1   : > { %v728_v53 = vpop.f32.mrf.mxu2  ;;  %v366_v57 = vpop.f32.mrf.mxu0 }
  0xa2   : > { %v807_v56 = vadd.f32 %v728_v53, %v469_v51  ;;  %v471_v59 = vpop.f32.mrf.mxu1 }
  0xa3   : > { %v472_v62 = vadd.f32 %v471_v59, %v366_v57 }
  0xa4   : > { %v843_v60 = vadd.f32 %v1383_v44, %v807_v56  ;;  %1081 = vmatmul.msk.bf16.gmra.mxu0 %vm296_vm2, %v1211_v54  ;;  %1195 = vmatmul.msk.bf16.gmra.mxu3 %vm296_vm2, %v1233_v55 }
  0xa5   : > { %1105 = vmatmul.msk.bf16.gmra.mxu1 %vm296_vm2, %v1210_v37 }
  0xa6   : > { %v875_v61 = vmax.f32 %v843_v60, 0.0  ;;  %1191 = vmatmul.msk.bf16.gmra.mxu2 %vm296_vm2, %v1229_v58 }
  0xa7   : > { %v1406_v63 = vpop.f32.mrf.mxu3 }
  0xa8   : > { %908 = vst.msk [vmem:[%s1390_s8 + $0x8] sm:$0xff] %vm906_vm3, %v875_v61 }
  0xa9   : > { %v731_v0 = vpop.f32.mrf.mxu2  ;;  %v368_v2 = vpop.f32.mrf.mxu0 }
  0xaa   : > { %v808_v1 = vadd.f32 %v731_v0, %v472_v62  ;;  %v473_v3 = vpop.f32.mrf.mxu1 }
  0xab   : > { %v474_v6 = vadd.f32 %v473_v3, %v368_v2 }
  0xac   : > { %v844_v4 = vadd.f32 %v1383_v44, %v808_v1 }
  0xae   : > { %v876_v5 = vmax.f32 %v844_v4, 0.0 }
  0xaf   : > { %v1411_v7 = vpop.f32.mrf.mxu3 }
  0xb0   : > { %909 = vst.msk [vmem:[%s1390_s8 + $0x10] sm:$0xff] %vm906_vm3, %v876_v5 }
  0xb1   : > { %v733_v8 = vpop.f32.mrf.mxu2  ;;  %v371_v12 = vpop.f32.mrf.mxu0 }
  0xb2   : > { %v809_v11 = vadd.f32 %v733_v8, %v474_v6  ;;  %v476_v14 = vpop.f32.mrf.mxu1 }
  0xb3   : > { %v477_v17 = vadd.f32 %v476_v14, %v371_v12 }
  0xb4   : > { %v845_v15 = vadd.f32 %v1383_v44, %v809_v11  ;;  %1082 = vmatmul.msk.bf16.gmra.mxu0 %vm296_vm2, %v1212_v9  ;;  %1196 = vmatmul.msk.bf16.gmra.mxu3 %vm296_vm2, %v1234_v10 }
  0xb5   : > { %1106 = vmatmul.msk.bf16.gmra.mxu1 %vm296_vm2, %v1211_v54 }
  0xb6   : > { %v877_v16 = vmax.f32 %v845_v15, 0.0  ;;  %1192 = vmatmul.msk.bf16.gmra.mxu2 %vm296_vm2, %v1230_v13 }
  0xb7   : > { %v1423_v18 = vpop.f32.mrf.mxu3 }
  0xb8   : > { %910 = vst.msk [vmem:[%s1390_s8 + $0x18] sm:$0xff] %vm906_vm3, %v877_v16 }
  0xb9   : > { %v736_v19 = vpop.f32.mrf.mxu2  ;;  %v373_v21 = vpop.f32.mrf.mxu0 }
  0xba   : > { %v810_v20 = vadd.f32 %v736_v19, %v477_v17  ;;  %v478_v22 = vpop.f32.mrf.mxu1 }
  0xbb   : > { %v479_v25 = vadd.f32 %v478_v22, %v373_v21 }
  0xbc   : > { %v846_v23 = vadd.f32 %v1383_v44, %v810_v20 }
  0xbe   : > { %v878_v24 = vmax.f32 %v846_v23, 0.0 }
  0xbf   : > { %v1428_v26 = vpop.f32.mrf.mxu3 }
  0xc0   : > { %911 = vst.msk [vmem:[%s1390_s8 + $0x20] sm:$0xff] %vm906_vm3, %v878_v24 }
  0xc1   : > { %v738_v27 = vpop.f32.mrf.mxu2  ;;  %v376_v31 = vpop.f32.mrf.mxu0 }
  0xc2   : > { %v811_v30 = vadd.f32 %v738_v27, %v479_v25  ;;  %v481_v33 = vpop.f32.mrf.mxu1 }
  0xc3   : > { %v482_v36 = vadd.f32 %v481_v33, %v376_v31 }
  0xc4   : > { %v847_v34 = vadd.f32 %v1383_v44, %v811_v30  ;;  %1083 = vmatmul.msk.bf16.gmra.mxu0 %vm296_vm2, %v1345_v29  ;;  %1197 = vmatmul.msk.bf16.gmra.mxu3 %vm296_vm2, %v1235_v28 }
  0xc5   : > { %1107 = vmatmul.msk.bf16.gmra.mxu1 %vm296_vm2, %v1212_v9 }
  0xc6   : > { %v879_v35 = vmax.f32 %v847_v34, 0.0  ;;  %1193 = vmatmul.msk.bf16.gmra.mxu2 %vm296_vm2, %v1231_v32 }
  0xc7   : > { %v1440_v37 = vpop.f32.mrf.mxu3 }
  0xc8   : > { %912 = vst.msk [vmem:[%s1390_s8 + $0x28] sm:$0xff] %vm906_vm3, %v879_v35 }
  0xc9   : > { %v741_v38 = vpop.f32.mrf.mxu2  ;;  %v378_v40 = vpop.f32.mrf.mxu0 }
  0xca   : > { %v812_v39 = vadd.f32 %v741_v38, %v482_v36  ;;  %v483_v41 = vpop.f32.mrf.mxu1 }
  0xcb   : > { %v484_v45 = vadd.f32 %v483_v41, %v378_v40 }
  0xcc   : > { %v848_v42 = vadd.f32 %v1383_v44, %v812_v39 }
  0xce   : > { %v880_v29 = vmax.f32 %v848_v42, 0.0 }
  0xcf   : > { %v1445_v46 = vpop.f32.mrf.mxu3 }
  0xd0   : > { %913 = vst.msk [vmem:[%s1390_s8 + $0x30] sm:$0xff] %vm906_vm3, %v880_v29 }
  0xd1   : > { %v743_v47 = vpop.f32.mrf.mxu2  ;;  %v381_v49 = vpop.f32.mrf.mxu0 }
  0xd2   : > { %v813_v48 = vadd.f32 %v743_v47, %v484_v45  ;;  %v486_v50 = vpop.f32.mrf.mxu1 }
  0xd3   : > { %v487_v54 = vadd.f32 %v486_v50, %v381_v49 }
  0xd4   : > { %v849_v51 = vadd.f32 %v1383_v44, %v813_v48 }
  0xd6   : > { %v881_v53 = vmax.f32 %v849_v51, 0.0 }
  0xd7   : > { %v1450_v55 = vpop.f32.mrf.mxu3 }
  0xd8   : > { %914 = vst.msk [vmem:[%s1390_s8 + $0x38] sm:$0xff] %vm906_vm3, %v881_v53 }
  0xd9   : > { %v746_v56 = vpop.f32.mrf.mxu2  ;;  %v383_v58 = vpop.f32.mrf.mxu0 }
  0xda   : > { %v814_v57 = vadd.f32 %v746_v56, %v487_v54  ;;  %v488_v59 = vpop.f32.mrf.mxu1 }
  0xdb   : > { %v489_v62 = vadd.f32 %v488_v59, %v383_v58 }
  0xdc   : > { %v850_v60 = vadd.f32 %v1383_v44, %v814_v57 }
  0xde   : > { %v882_v61 = vmax.f32 %v850_v60, 0.0 }
  0xdf   : > { %v1455_v0 = vpop.f32.mrf.mxu3 }
  0xe0   : > { %915 = vst.msk [vmem:[%s1390_s8 + $0x40] sm:$0xff] %vm906_vm3, %v882_v61 }
  0xe1   : > { %v748_v1 = vpop.f32.mrf.mxu2  ;;  %v386_v3 = vpop.f32.mrf.mxu0 }
  0xe2   : > { %v815_v2 = vadd.f32 %v748_v1, %v489_v62  ;;  %v491_v4 = vpop.f32.mrf.mxu1 }
  0xe3   : > { %v492_v8 = vadd.f32 %v491_v4, %v386_v3  ;;  %v527_v3 = vadd.f32 %v1450_v55, %v1378_v43 }
  0xe4   : > { %v851_v5 = vadd.f32 %v1383_v44, %v815_v2 }
  0xe6   : > { %v883_v6 = vmax.f32 %v851_v5, 0.0 }
  0xe7   : > { %v1460_v9 = vpop.f32.mrf.mxu3 }
  0xe8   : > { %916 = vst.msk [vmem:[%s1390_s8 + $0x48] sm:$0xff] %vm906_vm3, %v883_v6 }
  0xe9   : > { %v751_v10 = vpop.f32.mrf.mxu2  ;;  %v388_v12 = vpop.f32.mrf.mxu0 }
  0xea   : > { %v816_v11 = vadd.f32 %v751_v10, %v492_v8  ;;  %v493_v13 = vpop.f32.mrf.mxu1 }
  0xeb   : > { %v494_v16 = vadd.f32 %v493_v13, %v388_v12 }
  0xec   : > { %v852_v14 = vadd.f32 %v1383_v44, %v816_v11 }
  0xee   : > { %v884_v15 = vmax.f32 %v852_v14, 0.0 }
  0xef   : > { %v1465_v17 = vpop.f32.mrf.mxu3 }
  0xf0   : > { %917 = vst.msk [vmem:[%s1390_s8 + $0x50] sm:$0xff] %vm906_vm3, %v884_v15 }
  0xf1   : > { %v753_v19 = vpop.f32.mrf.mxu2  ;;  %v391_v21 = vpop.f32.mrf.mxu0 }
  0xf2   : > { %v817_v20 = vadd.f32 %v753_v19, %v494_v16  ;;  %v496_v22 = vpop.f32.mrf.mxu1  ;;  %v529_v16 = vadd.f32 %v1455_v0, %v1394_v52  ;;  %v532_v0 = vadd.f32 %v1460_v9, %v1406_v63 }
  0xf3   : > { %v497_v25 = vadd.f32 %v496_v22, %v391_v21 }
  0xf4   : > { %v853_v23 = vadd.f32 %v1383_v44, %v817_v20 }
  0xf6   : > { %v885_v24 = vmax.f32 %v853_v23, 0.0 }
  0xf7   : > { %v1470_v27 = vpop.f32.mrf.mxu3 }
  0xf8   : > { %918 = vst.msk [vmem:[%s1390_s8 + $0x58] sm:$0xff] %vm906_vm3, %v885_v24 }
  0xf9   : > { %v756_v28 = vpop.f32.mrf.mxu2  ;;  %v393_v31 = vpop.f32.mrf.mxu0 }
  0xfa   : > { %v818_v30 = vadd.f32 %v756_v28, %v497_v25  ;;  %v498_v32 = vpop.f32.mrf.mxu1 }
  0xfb   : > { %v499_v35 = vadd.f32 %v498_v32, %v393_v31 }
  0xfc   : > { %v854_v33 = vadd.f32 %v1383_v44, %v818_v30 }
  0xfe   : > { %v886_v34 = vmax.f32 %v854_v33, 0.0 }
  0xff   : > { %v1475_v36 = vpop.f32.mrf.mxu3 }
 0x100   : > { %919 = vst.msk [vmem:[%s1390_s8 + $0x60] sm:$0xff] %vm906_vm3, %v886_v34 }
 0x101   : > { %v758_v38 = vpop.f32.mrf.mxu2  ;;  %v396_v40 = vpop.f32.mrf.mxu0 }
 0x102   : > { %v819_v39 = vadd.f32 %v758_v38, %v499_v35  ;;  %v501_v41 = vpop.f32.mrf.mxu1 }
 0x103   : > { %v502_v45 = vadd.f32 %v501_v41, %v396_v40 }
 0x104   : > { %v855_v42 = vadd.f32 %v1383_v44, %v819_v39 }
 0x106   : > { %v887_v29 = vmax.f32 %v855_v42, 0.0 }
 0x107   : > { %v1480_v47 = vpop.f32.mrf.mxu3 }
 0x108   : > { %920 = vst.msk [vmem:[%s1390_s8 + $0x68] sm:$0xff] %vm906_vm3, %v887_v29  ;;  %v534_v29 = vadd.f32 %v1465_v17, %v1411_v7  ;;  %v537_v17 = vadd.f32 %v1470_v27, %v1423_v18 }
 0x109   : > { %v761_v48 = vpop.f32.mrf.mxu2  ;;  %v398_v50 = vpop.f32.mrf.mxu0 }
 0x10a   : > { %v820_v49 = vadd.f32 %v761_v48, %v502_v45  ;;  %v503_v51 = vpop.f32.mrf.mxu1 }
 0x10b   : > { %v504_v56 = vadd.f32 %v503_v51, %v398_v50 }
 0x10c   : > { %v856_v53 = vadd.f32 %v1383_v44, %v820_v49 }
 0x10e   : > { %v888_v54 = vmax.f32 %v856_v53, 0.0 }
 0x10f   : > { %v1485_v57 = vpop.f32.mrf.mxu3 }
 0x110   : > { %921 = vst.msk [vmem:[%s1390_s8 + $0x70] sm:$0xff] %vm906_vm3, %v888_v54 }
 0x111   : > { %v763_v58 = vpop.f32.mrf.mxu2  ;;  %v401_v60 = vpop.f32.mrf.mxu0 }
 0x112   : > { %v821_v59 = vadd.f32 %v763_v58, %v504_v56  ;;  %v506_v61 = vpop.f32.mrf.mxu1 }
 0x113   : > { %v507_v2 = vadd.f32 %v506_v61, %v401_v60 }
 0x114   : > { %v857_v62 = vadd.f32 %v1383_v44, %v821_v59 }
 0x116   : > { %v889_v1 = vmax.f32 %v857_v62, 0.0 }
 0x117   : > { %v786_v4 = vpop.f32.mrf.mxu3 }
 0x118   : > { %922 = vst.msk [vmem:[%s1390_s8 + $0x78] sm:$0xff] %vm906_vm3, %v889_v1  ;;  %v830_v6 = vadd.f32 %v786_v4, %v527_v3 }
 0x119   : > { %v766_v5 = vpop.f32.mrf.mxu2  ;;  %v403_v10 = vpop.f32.mrf.mxu0 }
 0x11a   : > { %v822_v8 = vadd.f32 %v766_v5, %v507_v2  ;;  %v866_v11 = vadd.f32 %v1383_v44, %v830_v6  ;;  %v508_v12 = vpop.f32.mrf.mxu1 }
 0x11b   : > { %v509_v43 = vadd.f32 %v508_v12, %v403_v10 }
 0x11c   : > { %v858_v13 = vadd.f32 %v1383_v44, %v822_v8  ;;  %v898_v14 = vmax.f32 %v866_v11, 0.0  ;;  %v539_v8 = vadd.f32 %v1475_v36, %v1428_v26  ;;  %v542_v36 = vadd.f32 %v1480_v47, %v1440_v37 }
 0x11d   : > { %v544_v37 = vadd.f32 %v1485_v57, %v1445_v46 }
 0x11e   : > { %v890_v15 = vmax.f32 %v858_v13, 0.0  ;;  %931 = vst.msk [vmem:[%s1390_s8 + $0xc0] sm:$0xff] %vm906_vm3, %v898_v14 }
 0x11f   : > { %v788_v55 = vpop.f32.mrf.mxu3 }
 0x120   : > { %923 = vst.msk [vmem:[%s1390_s8 + $0x80] sm:$0xff] %vm906_vm3, %v890_v15  ;;  %v831_v20 = vadd.f32 %v788_v55, %v529_v16 }
 0x121   : > { %v768_v19 = vpop.f32.mrf.mxu2  ;;  %v406_v22 = vpop.f32.mrf.mxu0 }
 0x122   : > { %v823_v21 = vadd.f32 %v768_v19, %v509_v43  ;;  %v867_v23 = vadd.f32 %v1383_v44, %v831_v20  ;;  %v511_v24 = vpop.f32.mrf.mxu1 }
 0x123   : > { %v512_v52 = vadd.f32 %v511_v24, %v406_v22 }
 0x124   : > { %v859_v25 = vadd.f32 %v1383_v44, %v823_v21  ;;  %v899_v28 = vmax.f32 %v867_v23, 0.0 }
 0x126   : > { %v891_v30 = vmax.f32 %v859_v25, 0.0  ;;  %932 = vst.msk [vmem:[%s1390_s8 + $0xc8] sm:$0xff] %vm906_vm3, %v899_v28 }
 0x127   : > { %v791_v31 = vpop.f32.mrf.mxu3 }
 0x128   : > { %924 = vst.msk [vmem:[%s1390_s8 + $0x88] sm:$0xff] %vm906_vm3, %v891_v30  ;;  %v832_v33 = vadd.f32 %v791_v31, %v532_v0 }
 0x129   : > { %v771_v32 = vpop.f32.mrf.mxu2  ;;  %v408_v35 = vpop.f32.mrf.mxu0 }
 0x12a   : > { %v824_v34 = vadd.f32 %v771_v32, %v512_v52  ;;  %v868_v38 = vadd.f32 %v1383_v44, %v832_v33  ;;  %v513_v39 = vpop.f32.mrf.mxu1 }
 0x12b   : > { %v514_v63 = vadd.f32 %v513_v39, %v408_v35 }
 0x12c   : > { %v860_v40 = vadd.f32 %v1383_v44, %v824_v34  ;;  %v900_v41 = vmax.f32 %v868_v38, 0.0 }
 0x12e   : > { %v892_v42 = vmax.f32 %v860_v40, 0.0  ;;  %933 = vst.msk [vmem:[%s1390_s8 + $0xd0] sm:$0xff] %vm906_vm3, %v900_v41 }
 0x12f   : > { %v793_v9 = vpop.f32.mrf.mxu3 }
 0x130   : > { %925 = vst.msk [vmem:[%s1390_s8 + $0x90] sm:$0xff] %vm906_vm3, %v892_v42  ;;  %v833_v48 = vadd.f32 %v793_v9, %v534_v29 }
 0x131   : > { %v773_v45 = vpop.f32.mrf.mxu2  ;;  %v411_v50 = vpop.f32.mrf.mxu0 }
 0x132   : > { %v825_v49 = vadd.f32 %v773_v45, %v514_v63  ;;  %v869_v51 = vadd.f32 %v1383_v44, %v833_v48  ;;  %v516_v53 = vpop.f32.mrf.mxu1 }
 0x133   : > { %v517_v7 = vadd.f32 %v516_v53, %v411_v50 }
 0x134   : > { %v861_v54 = vadd.f32 %v1383_v44, %v825_v49  ;;  %v901_v56 = vmax.f32 %v869_v51, 0.0 }
 0x136   : > { %v893_v58 = vmax.f32 %v861_v54, 0.0  ;;  %934 = vst.msk [vmem:[%s1390_s8 + $0xd8] sm:$0xff] %vm906_vm3, %v901_v56 }
 0x137   : > { %v796_v59 = vpop.f32.mrf.mxu3 }
 0x138   : > { %926 = vst.msk [vmem:[%s1390_s8 + $0x98] sm:$0xff] %vm906_vm3, %v893_v58  ;;  %v834_v61 = vadd.f32 %v796_v59, %v537_v17 }
 0x139   : > { %v776_v60 = vpop.f32.mrf.mxu2  ;;  %v413_v1 = vpop.f32.mrf.mxu0 }
 0x13a   : > { %v826_v62 = vadd.f32 %v776_v60, %v517_v7  ;;  %v870_v2 = vadd.f32 %v1383_v44, %v834_v61  ;;  %v518_v3 = vpop.f32.mrf.mxu1 }
 0x13b   : > { %v519_v18 = vadd.f32 %v518_v3, %v413_v1 }
 0x13c   : > { %v862_v4 = vadd.f32 %v1383_v44, %v826_v62  ;;  %v902_v5 = vmax.f32 %v870_v2, 0.0 }
 0x13e   : > { %v894_v6 = vmax.f32 %v862_v4, 0.0  ;;  %935 = vst.msk [vmem:[%s1390_s8 + $0xe0] sm:$0xff] %vm906_vm3, %v902_v5 }
 0x13f   : > { %v798_v27 = vpop.f32.mrf.mxu3 }
 0x140   : > { %927 = vst.msk [vmem:[%s1390_s8 + $0xa0] sm:$0xff] %vm906_vm3, %v894_v6  ;;  %v835_v11 = vadd.f32 %v798_v27, %v539_v8 }
 0x141   : > { %v778_v10 = vpop.f32.mrf.mxu2  ;;  %v416_v14 = vpop.f32.mrf.mxu0 }
 0x142   : > { %v827_v12 = vadd.f32 %v778_v10, %v519_v18  ;;  %v871_v13 = vadd.f32 %v1383_v44, %v835_v11  ;;  %v521_v15 = vpop.f32.mrf.mxu1 }
 0x143   : > { %v522_v26 = vadd.f32 %v521_v15, %v416_v14 }
 0x144   : > { %v863_v16 = vadd.f32 %v1383_v44, %v827_v12  ;;  %v903_v43 = vmax.f32 %v871_v13, 0.0 }
 0x146   : > { %v895_v55 = vmax.f32 %v863_v16, 0.0  ;;  %936 = vst.msk [vmem:[%s1390_s8 + $0xe8] sm:$0xff] %vm906_vm3, %v903_v43 }
 0x147   : > { %v801_v19 = vpop.f32.mrf.mxu3 }
 0x148   : > { %928 = vst.msk [vmem:[%s1390_s8 + $0xa8] sm:$0xff] %vm906_vm3, %v895_v55  ;;  %v836_v21 = vadd.f32 %v801_v19, %v542_v36 }
 0x149   : > { %v781_v20 = vpop.f32.mrf.mxu2  ;;  %v418_v28 = vpop.f32.mrf.mxu0 }
 0x14a   : > { %v828_v22 = vadd.f32 %v781_v20, %v522_v26  ;;  %v872_v23 = vadd.f32 %v1383_v44, %v836_v21  ;;  %v523_v30 = vpop.f32.mrf.mxu1 }
 0x14b   : > { %v524_v47 = vadd.f32 %v523_v30, %v418_v28 }
 0x14c   : > { %v864_v24 = vadd.f32 %v1383_v44, %v828_v22  ;;  %v904_v25 = vmax.f32 %v872_v23, 0.0 }
 0x14e   : > { %v896_v52 = vmax.f32 %v864_v24, 0.0  ;;  %937 = vst.msk [vmem:[%s1390_s8 + $0xf0] sm:$0xff] %vm906_vm3, %v904_v25 }
 0x14f   : > { %v803_v0 = vpop.f32.mrf.mxu3 }
 0x150   : > { %929 = vst.msk [vmem:[%s1390_s8 + $0xb0] sm:$0xff] %vm906_vm3, %v896_v52  ;;  %v837_v32 = vadd.f32 %v803_v0, %v544_v37 }
 0x151   : > { %v783_v31 = vpop.f32.mrf.mxu2 }
 0x152   : > { %v829_v33 = vadd.f32 %v783_v31, %v524_v47  ;;  %v873_v34 = vadd.f32 %v1383_v44, %v837_v32 }
 0x154   : > { %v865_v35 = vadd.f32 %v1383_v44, %v829_v33  ;;  %v905_v38 = vmax.f32 %v873_v34, 0.0 }
 0x156   : > { %v897_v39 = vmax.f32 %v865_v35, 0.0  ;;  %938 = vst.msk [vmem:[%s1390_s8 + $0xf8] sm:$0xff] %vm906_vm3, %v905_v38 }
 0x158   : > { %930 = vst.msk [vmem:[%s1390_s8 + $0xb8] sm:$0xff] %vm906_vm3, %v897_v39 }
 0x159 PF: > { %s13_s12 = sadd.s32 1, %s1257_s12  }
 0x15a   : > { %p10_p4 = scmp.ge.s32.totalorder %s13_s12, 4  }
 0x15c   :  { %12 = sbr.rel (!%p10_p4) target bundleno = 1 (0x1), region = 64 }

</bundles_post_ra>
